<compile_context>
chip_gen: v7x
topology: tpu7x:2x2x1
jax: 0.10.0
libtpu: 0.0.40
codegen_flags: <defaults>
</compile_context>

<pallas_src>
import functools

import numpy as np

import jax
import jax.numpy as jnp
from jax import lax
from jax.experimental import pallas as pl
from jax.experimental.pallas import tpu as pltpu


# ----------------------------------------------------------------------------------
# Compile-time Gaussian taps (matches the PyTorch `gaussian` helper, offset = 0).
# ----------------------------------------------------------------------------------
def _gaussian_taps_1d(ksize: int, sigma: float, offset: float = 0.0) -> np.ndarray:
    if int(ksize) != ksize or ksize % 2 == 0 or ksize <= 0:
        raise TypeError("ksize must be an odd positive integer. Got {}".format(ksize))
    xs = np.arange(ksize, dtype=np.float64)
    g = np.exp(-((xs - ksize // 2 - offset) ** 2) / (2.0 * float(sigma) ** 2))
    return (g / g.sum()).astype(np.float32)


def _round_up(v: int, m: int) -> int:
    return ((v + m - 1) // m) * m


def _vmem_capacity_bytes() -> int:
    try:
        cap = getattr(pltpu.get_tpu_info(), "vmem_capacity_bytes", None)
        if cap:
            return int(cap)
    except Exception:
        pass
    return 64 * 1024 * 1024  # conservative default (v7x per-core VMEM)


# ----------------------------------------------------------------------------------
# Tiling selection: planes-per-block and halo'd H strips sized from the VMEM budget.
# ----------------------------------------------------------------------------------
def _choose_tiling(N, H, W, ho, wo, kh, itemsize, vmem_cap,
                   planes_per_tile=None, strip_rows=None):
    halo_h = _round_up(max(kh - 1, 1), 8)            # halo rows fetched per strip
    budget = int(0.35 * vmem_cap)                     # dbl-buffered blocks + f32 temps

    def footprint(nb, hb_in, hb_out):
        in_b = 2 * nb * (hb_in + halo_h) * W * itemsize   # x_cur + halo, double buffered
        out_b = 2 * nb * hb_out * wo * itemsize           # output, double buffered
        tmp_b = 2 * nb * (hb_in + halo_h) * W * 4         # f32 concat / pass temporaries
        return in_b + out_b + tmp_b

    # Planes per grid step: target ~2 MiB of input per block (amortize ~0.35us/step).
    if planes_per_tile is not None:
        nb = max(1, min(int(planes_per_tile), N))
    else:
        plane_b = max(H * W * itemsize, 1)
        nb = max(1, min(N, (2 * 1024 * 1024) // plane_b))
        while nb > 1 and footprint(nb, H, ho) > budget:
            nb = max(1, nb // 2)

    # Strip height: full plane if it fits, otherwise halve until within budget.
    if strip_rows is not None:
        hs = max(halo_h, _round_up(int(strip_rows), halo_h))
    elif footprint(nb, H, ho) <= budget:
        hs = None
    else:
        hs = _round_up(ho, halo_h)
        while hs > halo_h and footprint(nb, hs, hs) > budget:
            hs = max(halo_h, _round_up(hs // 2, halo_h))

    if hs is None or hs >= ho:
        # Full-plane path: full-extent H blocks (no ragged H blocks at all).
        if planes_per_tile is None and N > 1 and nb >= N:
            nb = pl.cdiv(N, 2)        # >=2 grid steps so both v7x TensorCores get work
        return nb, H, ho, 1, halo_h

    return nb, hs, hs, pl.cdiv(ho, hs), halo_h


# ----------------------------------------------------------------------------------
# Kernel body: separable valid 2D Gaussian on one (planes, rows-strip, W) block.
# ----------------------------------------------------------------------------------
def _sep_blur_kernel(xc_ref, xh_ref, o_ref, *, kh, kw, taps_h, taps_w,
                     use_roll_h, use_roll_w):
    """xc_ref: (nb, hb_in, W) strip rows; xh_ref: (nb, halo_h, W) halo rows below the
    strip; o_ref: (nb, hb_out, wo).  Taps are compile-time Python floats."""
    nb, hb_out, wo = o_ref.shape

    # Stack strip + halo rows once and promote to f32 for accumulation.
    x = jnp.concatenate([xc_ref[...], xh_ref[...]], axis=1).astype(jnp.float32)
    hcat = x.shape[1]
    wfull = x.shape[2]

    # ---- vertical pass (shifts along the sublane / H axis) -------------------------
    if use_roll_h:
        v = x * taps_h[0]
        for ki in range(1, kh):
            v = v + pltpu.roll(x, hcat - ki, axis=1) * taps_h[ki]
        v = v[:, :hb_out, :]                     # wrapped / halo rows are discarded
    else:
        v = x[:, 0:hb_out, :] * taps_h[0]
        for ki in range(1, kh):
            v = v + x[:, ki:ki + hb_out, :] * taps_h[ki]

    # ---- horizontal pass (shifts along the lane / W axis) --------------------------
    if use_roll_w:
        h = v * taps_w[0]
        for kj in range(1, kw):
            h = h + pltpu.roll(v, wfull - kj, axis=2) * taps_w[kj]
        h = h[:, :, :wo]                          # wrapped columns are discarded
    else:
        h = v[:, :, 0:wo] * taps_w[0]
        for kj in range(1, kw):
            h = h + v[:, :, kj:kj + wo] * taps_w[kj]

    o_ref[...] = h.astype(o_ref.dtype)


# ----------------------------------------------------------------------------------
# Public wrapper: equivalent of GaussianBlur(kernel_size, sigma, rescale, padding=0)(x).
# ----------------------------------------------------------------------------------
def gaussian_blur(x: jnp.ndarray,
                  kernel_size=(3, 3),
                  sigma=(1.5, 1.5),
                  rescale=False,
                  *,
                  planes_per_tile=None,
                  strip_rows=None) -> jnp.ndarray:
    if x.ndim != 4:
        raise ValueError("Expected BxCxHxW input, got shape {}".format(x.shape))
    if not jnp.issubdtype(x.dtype, jnp.floating):
        # TODO(synk): integer dtypes would need round-to-nearest on the final cast.
        raise TypeError("gaussian_blur expects a floating-point input")
    B, C, H, W = x.shape
    kh, kw = int(kernel_size[0]), int(kernel_size[1])
    if H < kh or W < kw:
        raise ValueError("padding=0 requires H >= kernel_size[0] and W >= kernel_size[1]")
    ho, wo = H - kh + 1, W - kw + 1
    N = B * C

    # --- compile-time taps; rescale factors folded into the horizontal taps --------
    th = _gaussian_taps_1d(kh, float(sigma[0])).astype(np.float64)
    tw = _gaussian_taps_1d(kw, float(sigma[1])).astype(np.float64)
    if rescale:
        k2d = np.outer(th, tw)
        s1 = float(np.sqrt(np.sum(k2d * k2d)))          # create_gaussian_kernel rescale
        s2 = float(np.sqrt(np.sum((k2d / s1) ** 2)))    # forward()'s getRescaleTensor (~1)
        tw = tw / (s1 * s2)
    taps_h = tuple(float(t) for t in th)
    taps_w = tuple(float(t) for t in tw)

    # --- tiling / VMEM budgeting (generation aware) ---------------------------------
    itemsize = jnp.dtype(x.dtype).itemsize
    vmem_cap = _vmem_capacity_bytes()
    nb, hb_in, hb_out, ns, halo_h = _choose_tiling(
        N, H, W, ho, wo, kh, itemsize, vmem_cap,
        planes_per_tile=planes_per_tile, strip_rows=strip_rows)
    n_tiles = pl.cdiv(N, nb)

    use_roll_w = (W % 128 == 0)
    use_roll_h = use_roll_w and ((hb_in + halo_h) % 8 == 0)

    if ns == 1:
        halo_map = lambda n, s: (n, 0, 0)                      # halo unused on this path
    else:
        step = hb_in // halo_h
        max_halo_idx = pl.cdiv(H, halo_h) - 1
        halo_map = lambda n, s: (n, jnp.minimum((s + 1) * step, max_halo_idx), 0)

    kernel_fn = functools.partial(
        _sep_blur_kernel, kh=kh, kw=kw, taps_h=taps_h, taps_w=taps_w,
        use_roll_h=use_roll_h, use_roll_w=use_roll_w)

    flops = 2 * N * ho * (W * kh + wo * kw)
    bytes_accessed = (N * H * W + N * ns * halo_h * W + N * ho * wo) * itemsize

    x_nhw = x.reshape(N, H, W)                                  # free reshape, no copy
    out_nhw = pl.pallas_call(
        kernel_fn,
        out_shape=jax.ShapeDtypeStruct((N, ho, wo), x.dtype),
        grid=(n_tiles, ns),
        in_specs=[
            pl.BlockSpec((nb, hb_in, W), lambda n, s: (n, s, 0)),    # strip rows
            pl.BlockSpec((nb, halo_h, W), halo_map),                 # (kh-1)-row halo
        ],
        out_specs=pl.BlockSpec((nb, hb_out, wo), lambda n, s: (n, s, 0)),
        compiler_params=pltpu.CompilerParams(
            dimension_semantics=("parallel", "parallel"),
            vmem_limit_bytes=int(0.75 * vmem_cap)),
        cost_estimate=pl.CostEstimate(flops=flops, transcendentals=0,
                                      bytes_accessed=bytes_accessed),
    )(x_nhw, x_nhw)

    return out_nhw.reshape(B, C, ho, wo)


# ----------------------------------------------------------------------------------
# Pure-JAX reference (mirrors the PyTorch module exactly).
# ----------------------------------------------------------------------------------
def _reference_blur(x, kernel_size, sigma, rescale):
    B, C, H, W = x.shape
    kh, kw = kernel_size
    th = _gaussian_taps_1d(kh, float(sigma[0]))
    tw = _gaussian_taps_1d(kw, float(sigma[1]))
    k2d = np.outer(th, tw).astype(np.float32)
    if rescale:
        k2d = k2d / np.sqrt(np.sum(k2d * k2d))
    out = lax.conv_general_dilated(
        x.reshape(B * C, 1, H, W).astype(jnp.float32),
        jnp.asarray(k2d)[None, None, :, :],
        window_strides=(1, 1), padding="VALID",
        dimension_numbers=("NCHW", "OIHW", "NCHW"),
    ).reshape(B, C, H - kh + 1, W - kw + 1)
    if rescale:
        out = out / np.sqrt(np.sum(k2d * k2d))   # getRescaleTensor of rescaled kernel
    return out.astype(x.dtype)


if __name__ == "__main__":
    # Case 1: small, module-consistent shapes -> full-plane path, slice-based shifts.
    x1 = jax.random.normal(jax.random.PRNGKey(0), (2, 4, 16, 16), dtype=jnp.float32)
    y1 = jax.block_until_ready(gaussian_blur(x1, (3, 3), (1.5, 1.5), rescale=False))
    r1 = _reference_blur(x1, (3, 3), (1.5, 1.5), rescale=False)
    assert y1.shape == r1.shape == (2, 4, 14, 14)
    assert float(jnp.max(jnp.abs(y1 - r1))) < 1e-4

    # Case 2: forces the halo'd H-strip / plane-tile path, pltpu.roll shifts (W=256),
    # and the folded rescale.
    x2 = jax.random.normal(jax.random.PRNGKey(1), (1, 4, 72, 256), dtype=jnp.float32)
    y2 = jax.block_until_ready(
        gaussian_blur(x2, (9, 9), (2.5, 1.5), rescale=True,
                      planes_per_tile=2, strip_rows=16))
    r2 = _reference_blur(x2, (9, 9), (2.5, 1.5), rescale=True)
    assert y2.shape == r2.shape == (1, 4, 64, 248)
    assert float(jnp.max(jnp.abs(y2 - r2))) < 1e-3

    print("KERNEL_OK")
</pallas_src>

<mosaic_0001>
module attributes {stable_mosaic.version = 11 : i64} {
  func.func @_sep_blur_kernel(%arg0: i32, %arg1: i32, %arg2: memref<4x16x16xf32, #tpu.memory_space<vmem>>, %arg3: memref<4x8x16xf32, #tpu.memory_space<vmem>>, %arg4: memref<4x14x14xf32, #tpu.memory_space<vmem>>) attributes {dimension_semantics = [#tpu.dimension_semantics<parallel>, #tpu.dimension_semantics<parallel>], iteration_bounds = array<i64: 2, 1>, scalar_prefetch = 0 : i64, scratch_operands = 0 : i64, tpu.core_type = #tpu.core_type<tc>, window_params = [{transform_indices = @transform_0, window_bounds = array<i64: 4, 16, 16>}, {transform_indices = @transform_1, window_bounds = array<i64: 4, 8, 16>}, {transform_indices = @transform_2, window_bounds = array<i64: 4, 14, 14>}]} {
    %c0 = arith.constant 0 : index
    %c0_0 = arith.constant 0 : index
    %c0_1 = arith.constant 0 : index
    %0 = vector.load %arg2[%c0, %c0_0, %c0_1] : memref<4x16x16xf32, #tpu.memory_space<vmem>>, vector<4x16x16xf32>
    %c0_2 = arith.constant 0 : index
    %c0_3 = arith.constant 0 : index
    %c0_4 = arith.constant 0 : index
    %1 = vector.load %arg3[%c0_2, %c0_3, %c0_4] : memref<4x8x16xf32, #tpu.memory_space<vmem>>, vector<4x8x16xf32>
    %2 = tpu.concatenate %0, %1 in 1 : vector<4x16x16xf32>, vector<4x8x16xf32> -> vector<4x24x16xf32>
    %3 = vector.extract_strided_slice %2 {offsets = [0, 0, 0], sizes = [4, 14, 16], strides = [1, 1, 1]} : vector<4x24x16xf32> to vector<4x14x16xf32>
    %cst = arith.constant 0.307801336 : f32
    %4 = vector.broadcast %cst : f32 to vector<4x14x16xf32>
    %5 = arith.mulf %3, %4 : vector<4x14x16xf32>
    %6 = vector.extract_strided_slice %2 {offsets = [0, 1, 0], sizes = [4, 14, 16], strides = [1, 1, 1]} : vector<4x24x16xf32> to vector<4x14x16xf32>
    %cst_5 = arith.constant 0.384397328 : f32
    %7 = vector.broadcast %cst_5 : f32 to vector<4x14x16xf32>
    %8 = arith.mulf %6, %7 : vector<4x14x16xf32>
    %9 = arith.addf %5, %8 : vector<4x14x16xf32>
    %10 = vector.extract_strided_slice %2 {offsets = [0, 2, 0], sizes = [4, 14, 16], strides = [1, 1, 1]} : vector<4x24x16xf32> to vector<4x14x16xf32>
    %cst_6 = arith.constant 0.307801336 : f32
    %11 = vector.broadcast %cst_6 : f32 to vector<4x14x16xf32>
    %12 = arith.mulf %10, %11 : vector<4x14x16xf32>
    %13 = arith.addf %9, %12 : vector<4x14x16xf32>
    %14 = vector.extract_strided_slice %13 {offsets = [0, 0, 0], sizes = [4, 14, 14], strides = [1, 1, 1]} : vector<4x14x16xf32> to vector<4x14x14xf32>
    %cst_7 = arith.constant 0.307801336 : f32
    %15 = vector.broadcast %cst_7 : f32 to vector<4x14x14xf32>
    %16 = arith.mulf %14, %15 : vector<4x14x14xf32>
    %17 = vector.extract_strided_slice %13 {offsets = [0, 0, 1], sizes = [4, 14, 14], strides = [1, 1, 1]} : vector<4x14x16xf32> to vector<4x14x14xf32>
    %cst_8 = arith.constant 0.384397328 : f32
    %18 = vector.broadcast %cst_8 : f32 to vector<4x14x14xf32>
    %19 = arith.mulf %17, %18 : vector<4x14x14xf32>
    %20 = arith.addf %16, %19 : vector<4x14x14xf32>
    %21 = vector.extract_strided_slice %13 {offsets = [0, 0, 2], sizes = [4, 14, 14], strides = [1, 1, 1]} : vector<4x14x16xf32> to vector<4x14x14xf32>
    %cst_9 = arith.constant 0.307801336 : f32
    %22 = vector.broadcast %cst_9 : f32 to vector<4x14x14xf32>
    %23 = arith.mulf %21, %22 : vector<4x14x14xf32>
    %24 = arith.addf %20, %23 : vector<4x14x14xf32>
    %c0_10 = arith.constant 0 : index
    %c0_11 = arith.constant 0 : index
    %c0_12 = arith.constant 0 : index
    %25 = vector.load %arg4[%c0_10, %c0_11, %c0_12] : memref<4x14x14xf32, #tpu.memory_space<vmem>>, vector<4x14x14xf32>
    tpu.vector_store %arg4[%c0_10, %c0_11, %c0_12], %24 {strides = array<i32>} : memref<4x14x14xf32, #tpu.memory_space<vmem>>, vector<4x14x14xf32>,
    return
  }
  func.func @transform_0(%arg0: i32, %arg1: i32) -> (i32, i32, i32) {
    %c0_i32 = arith.constant 0 : i32
    %c0_i32_0 = arith.constant 0 : i32
    return %arg0, %arg1, %c0_i32 : i32, i32, i32
  }
  func.func @transform_1(%arg0: i32, %arg1: i32) -> (i32, i32, i32) {
    %c0_i32 = arith.constant 0 : i32
    %c0_i32_0 = arith.constant 0 : i32
    %c0_i32_1 = arith.constant 0 : i32
    return %arg0, %c0_i32, %c0_i32_0 : i32, i32, i32
  }
  func.func @transform_2(%arg0: i32, %arg1: i32) -> (i32, i32, i32) {
    %c0_i32 = arith.constant 0 : i32
    %c0_i32_0 = arith.constant 0 : i32
    return %arg0, %arg1, %c0_i32 : i32, i32, i32
  }
}

</mosaic_0001>

<bundles_post_ra>
// kernel: tpu_custom_call.1
= control target key start
LH: loop header
LB: loop body
LE: loop exit
PB: predicated region body
PF: predicated region fallthrough
CT: control target
= control target key end

     0   :  { %7 = vsyncpa [#allocation3], 0  ;;  %s1021_s0 = inlined_call_operand.hbm [shape: f32[8,16,16], index: 0, kind: input, shape index: {}]   ;;  %s1022_s1 = inlined_call_operand.hbm [shape: f32[8,16,16], index: 1, kind: input, shape index: {}]   ;;  %s1023_s2 = inlined_call_operand.vmem [shape: f32[8,14,14], index: 2, kind: output, shape index: {}]  }
   0x1   :  { %9 = vsyncpa [#allocation3 + $0x1], 0 }
   0x2   :  { %10 = vsyncpa [#allocation5], 0 }
   0x3   :  { %12 = vsyncpa [#allocation5 + $0x1], 0  ;;  %s791_s9 = smov 0   ;;  %s793_s10 = smov 0  }
   0x4   :  { %s795_s11 = smov 0   ;;  %s797_s12 = smov 0  }
   0x5   :  { %s799_s13 = smov 0   ;;  %s801_s14 = smov 0  }
   0x6 LB: > { %s564_s15 = sadd.s32 4294967295, %s767_s14   ;;  %s30_s16 = sadd.s32 1, %s763_s13  ;;  %s767_s14 = sphi %s801_s14, %s18_s14   ;;  %s763_s13 = sphi %s799_s13, %s1034_s13   ;;  %s759_s12 = sphi %s797_s12, %s1033_s12   ;;  %s755_s11 = sphi %s795_s11, %s1032_s11   ;;  %s751_s10 = sphi %s793_s10, %s1031_s10   ;;  %s747_s9 = sphi %s791_s9, %s1030_s9  }
   0x7   : > { %p32_p0 = scmp.ge.s32.totalorder %s30_s16, 2  ;;  %s39_s17 = sadd.s32 1, %s755_s11 }
   0x8   : > { %p46_p1 = scmp.ne.s32.totalorder %s755_s11, %s751_s10  ;;  %p47_p2 = scmp.eq.s32.totalorder %s767_s14, 0 }
   0x9   : > { %s1036_s16 = smov (%p32_p0, %s30_s16), 0  ;;  %p52_p4 = scmp.ne.s32.totalorder %s751_s10, %s747_s9 }
   0xa   : > { %p827_p3 = por %p47_p2, %p46_p1  ;;  %s34_s19 = ssub.s32 %s763_s13, %s1036_s16 }
   0xb   : > { %p53_p5 = scmp.eq.s32.totalorder %s564_s15, 0  ;;  %p37_p6 = scmp.eq.s32.totalorder %s34_s19, 0 }
   0xc   : > { %p599_p8 = scmp.lt.s32.totalorder %s767_s14, 2  ;;  %s843_s22 = sand.u32 1, %s755_s11  }
   0xd   : > { %p834_p7 = por %p53_p5, %p52_p4  ;;  %s584_s23 = sshll.u32 %s763_s13, 10 }
   0xe   : > { %s840_s21 = scalar_select %p37_p6, %s755_s11, %s39_s17  }
   0xf   : > { %s1026_s20 = scalar_select %p834_p7, 1, 0 }
  0x10   : > { %s568_s24 = sshll.u32 %s843_s22, 6  ;;  %s852_s27 = scalar_lea.hbm %s1021_s0, %s584_s23 }
  0x11   : > { %s134_s28 = scalar_lea.vmem [#allocation2], %s568_s24  ;;  %p856_p9 = pnand %p599_p8, %p827_p3 }
  0x12   : > { %s144_s29 = sshll.u32 %s134_s28, 4  ;;  %s131_s3 = scalar_lea.sflag [#allocation3], %s843_s22  ;;  %s860_s29 = int_to_ptr.vmem [resolvable:$true] %s144_s29 }
  0x13   : > { %s653_s4 = scalar_lea.hbm %s852_s27, 1024  ;;  %p655_p11 = pneg %p856_p9 }
  0x14   : > { %p654_p10 = scmp.ne.s32.totalorder %s852_s27, %s653_s4  ;;  %s658_s7 = scalar_lea.hbm %s1021_s0, 2048 }
  0x15   : > { %p659_p0 = scmp.lt.u32.totalorder %s852_s27, %s1021_s0  ;;  %p660_p1 = scmp.lt.u32.totalorder %s658_s7, %s653_s4 }
  0x16   : > { %p656_p12 = pnand %p655_p11, %p654_p10  ;;  %p662_p3 = scmp.lt.u32.totalorder %s653_s4, %s852_s27 }
  0x17   : > { %p661_p2 = por %p660_p1, %p659_p0 }
  0x18   : > { %p657_p13 = pneg %p656_p12 }
  0x19   : > { %p663_p4 = por %p662_p3, %p661_p2 }
  0x1b   : > { %p664_p5 = pnand %p663_p4, %p657_p13 }
  0x1d   : > { %667 = shalt.err (!%p664_p5)
}
  0x1e   : > { %s668_s15 = scalar_lea.vmem %s860_s29, 1024  ;;  %s769_s17 = smov [#allocation2]  }
  0x1f   : > { %p669_p6 = scmp.ne.s32.totalorder %s860_s29, %s668_s15  ;;  %s673_s18 = sshll.u32 %s769_s17, 4  ;;  %s674_s18 = int_to_ptr.vmem [resolvable:$false] %s673_s18 }
  0x20   : > { %s675_s19 = scalar_lea.vmem %s674_s18, 2048  ;;  %p676_p12 = scmp.lt.s32.totalorder %s860_s29, %s674_s18 }
  0x21   : > { %p671_p8 = pnand %p669_p6, %p655_p11  ;;  %p677_p0 = scmp.lt.s32.totalorder %s675_s19, %s668_s15 }
  0x23   : > { %p672_p10 = pneg %p671_p8  ;;  %p678_p1 = por %p677_p0, %p676_p12 }
  0x25   : > { %p679_p2 = pnand %p678_p1, %p672_p10 }
  0x27   : > { %682 = shalt.err (!%p679_p2)
}
  0x28   : > { %s770_s24 = smov 128   ;;  %s771_s25 = smov 8  }
  0x29   : > { %595 = dma.hbm_to_vmem [thread:$0]  (!%p856_p9), %s852_s27, 1024, %s860_s29, %s131_s3, %s770_s24, %s770_s24, %s771_s25  }
  0x2a   : > { %s898_s4 = scalar_lea.hbm %s1022_s1, %s584_s23  ;;  %p576_p13 = scmp.ge.s32.totalorder %s767_s14, 1 }
  0x2b   : > { %p174_p3 = scmp.lt.s32.totalorder %s767_s14, 3  ;;  %s572_s5 = sshll.u32 %s843_s22, 5 }
  0x2c   : > { %s158_s7 = scalar_lea.vmem [#allocation4], %s572_s5  ;;  %s155_s27 = scalar_lea.sflag [#allocation5], %s843_s22 }
  0x2d   : > { %p903_p4 = pnand %p576_p13, %p174_p3  ;;  %s166_s8 = sshll.u32 %s158_s7, 4  ;;  %s907_s8 = int_to_ptr.vmem [resolvable:$true] %s166_s8 }
  0x2e   : > { %s683_s29 = scalar_lea.hbm %s898_s4, 512  ;;  %s688_s9 = scalar_lea.hbm %s1022_s1, 2048 }
  0x2f   : > { %p684_p5 = scmp.ne.s32.totalorder %s898_s4, %s683_s29  ;;  %p689_p10 = scmp.lt.u32.totalorder %s898_s4, %s1022_s1 }
  0x30   : > { %p690_p12 = scmp.lt.u32.totalorder %s688_s9, %s683_s29  ;;  %p692_p1 = scmp.lt.u32.totalorder %s683_s29, %s898_s4 }
  0x31   : > { %p686_p6 = pnand %p684_p5, %p655_p11 }
  0x32   : > { %p691_p0 = por %p690_p12, %p689_p10 }
  0x33   : > { %p687_p8 = pneg %p686_p6 }
  0x34   : > { %p693_p2 = por %p692_p1, %p691_p0 }
  0x36   : > { %p694_p13 = pnand %p693_p2, %p687_p8 }
  0x38   : > { %697 = shalt.err (!%p694_p13)
}
  0x39   : > { %s698_s18 = scalar_lea.vmem %s907_s8, 512  ;;  %s772_s19 = smov [#allocation4]  }
  0x3a   : > { %p699_p3 = scmp.ne.s32.totalorder %s907_s8, %s698_s18  ;;  %s703_s26 = sshll.u32 %s772_s19, 4  ;;  %s704_s26 = int_to_ptr.vmem [resolvable:$false] %s703_s26 }
  0x3b   : > { %s705_s28 = scalar_lea.vmem %s704_s26, 1024  ;;  %p706_p7 = scmp.lt.s32.totalorder %s907_s8, %s704_s26 }
  0x3c   : > { %p701_p5 = pnand %p699_p3, %p655_p11  ;;  %p707_p10 = scmp.lt.s32.totalorder %s705_s28, %s698_s18 }
  0x3e   : > { %p702_p6 = pneg %p701_p5  ;;  %p708_p12 = por %p707_p10, %p706_p7 }
  0x40   : > { %p709_p0 = pnand %p708_p12, %p702_p6 }
  0x42   : > { %712 = shalt.err (!%p709_p0)
}
  0x43   : > { %s773_s5 = smov 256   ;;  %178 = sbr.rel (%p903_p4) target bundleno = 235 (0xeb), region = 28 }
  0x44   : > { %598 = dma.hbm_to_vmem [thread:$0]  (!%p856_p9), %s898_s4, 512, %s907_s8, %s155_s27, %s773_s5, %s770_s24, %s771_s25  }
  0x45   : > { %s180_s7 = sand.u32 (!%p903_p4), 1, %s751_s10   ;;  %p1029_p7 = scmp.ne.s32.totalorder (!%p903_p4), %s1026_s20, 0 }
  0x46   : > { %s577_s29 = sshll.u32 (!%p903_p4), %s180_s7, 6  ;;  %s181_s23 = scalar_lea.sflag (!%p903_p4), [#allocation3], %s180_s7 }
  0x47   : > { %s940_s3 = scalar_lea.vmem (!%p903_p4), [#allocation2], %s577_s29 }
  0x4a   : > { %738 = dma.done.wait (%p1029_p7), %s181_s23, 1024  }
  0x4b   : > { %740 = vsyncadd (%p1029_p7), %s181_s23, 4294966272  ;;  %s190_s22 = scalar_lea.sflag [#allocation5], %s180_s7 }
  0x4c   : > { %742 = dma.done.wait (%p1029_p7), %s190_s22, 512  }
  0x4d   : > { %744 = vsyncadd (%p1029_p7), %s190_s22, 4294966784  ;;  %v242_v0 = vld [vmem:[%s940_s3 + $0x18] sm:$0xff]  ;;  %v240_v1 = vld [vmem:[%s940_s3 + $0x8] sm:$0xff]  ;;  %vm271_vm0 = vcmask 1046528   ;;  %vm308_vm1 = vcmask 1045504   ;;  %s774_s20 = smov 127  }
  0x4e   : > { %v244_v2 = vld [vmem:[%s940_s3 + $0x28] sm:$0xff]  ;;  %v953_v3 = vmul.f32 0.30780134, %v242_v0  ;;  %v955_v4 = vmul.f32 0.38439733, %v242_v0  ;;  %v239_v12 = vld [vmem:[%s940_s3] sm:$0xff] }
  0x4f   : > { %v248_v5 = vmul.f32 0.30780134, %v240_v1  ;;  %v256_v6 = vmul.f32 0.38439733, %v240_v1  ;;  %v252_v7 = vmul.f32 0.30780134, %v244_v2 }
  0x50   : > { %v260_v8 = vmul.f32 0.38439733, %v244_v2  ;;  %v276_v9 = vrot.slane %v955_v4, 1  ;;  %v313_v10 = vrot.slane %v953_v3, 2  ;;  %v243_v13 = vld [vmem:[%s940_s3 + $0x20] sm:$0xff]  ;;  %v246_v18 = vld [vmem:[%s940_s3 + $0x38] sm:$0xff] }
  0x51   : > { %v310_v11 = vrot.slane %v248_v5, 2  ;;  %v273_v14 = vrot.slane %v256_v6, 1  ;;  %v316_v16 = vrot.slane %v252_v7, 2  ;;  %v247_v17 = vmul.f32 0.30780134, %v239_v12  ;;  %v241_v38 = vld [vmem:[%s940_s3 + $0x10] sm:$0xff] }
  0x52   : > { %v279_v15 = vrot.slane %v260_v8, 1  ;;  %v295_v19 = vadd.f32 %v276_v9, %v953_v3  ;;  %v255_v20 = vmul.f32 0.38439733, %v239_v12  ;;  %v251_v21 = vmul.f32 0.30780134, %v243_v13  ;;  %v245_v39 = vld [vmem:[%s940_s3 + $0x30] sm:$0xff] }
  0x53   : > { %v259_v22 = vmul.f32 0.38439733, %v243_v13  ;;  %v293_v23 = vadd.f32 %v273_v14, %v248_v5  ;;  %v309_v25 = vrot.slane %v247_v17, 2  ;;  %v254_v26 = vmul.f32 0.30780134, %v246_v18  ;;  %s775_s30 = smov 126  }
  0x54   : > { %v297_v24 = vadd.f32 %v279_v15, %v252_v7  ;;  %v332_v27 = vadd.f32 %v313_v10, %v295_v19  ;;  %v272_v28 = vrot.slane %v255_v20, 1  ;;  %v315_v30 = vrot.slane %v251_v21, 2  ;;  %s578_s24 = sshll.u32 %s759_s12, 2 }
  0x55   : > { %v278_v29 = vrot.slane %v259_v22, 1  ;;  %v330_v31 = vadd.f32 %v310_v11, %v293_v23  ;;  %v262_v33 = vmul.f32 0.38439733, %v246_v18  ;;  %v311_v36 = vsel %vm308_vm1, %v309_v25, %v310_v11  ;;  %p229_p9 = scmp.lt.s32.totalorder %s578_s24, 7 }
  0x56   : > { %v334_v32 = vadd.f32 %v316_v16, %v297_v24  ;;  %v348_v34 = vmul.f32 0.38439733, %v332_v27  ;;  %v274_v35 = vsel %vm271_vm0, %v272_v28, %v273_v14  ;;  %v317_v43 = vsel %vm308_vm1, %v315_v30, %v316_v16 }
  0x57   : > { %v280_v37 = vsel %vm271_vm0, %v278_v29, %v279_v15  ;;  %v346_v40 = vmul.f32 0.38439733, %v330_v31  ;;  %v292_v42 = vadd.f32 %v274_v35, %v247_v17  ;;  %v282_v45 = vrot.slane %v262_v33, 1  ;;  %s1038_s24 = smov (!%p229_p9, %s578_s24), 7 }
  0x58   : > { %v350_v41 = vmul.f32 0.38439733, %v334_v32  ;;  %367 = vrot.lane.b32.xlu1 %v348_v34, %s774_s20  ;;  %v296_v44 = vadd.f32 %v280_v37, %v251_v21  ;;  %v319_v46 = vrot.slane %v254_v26, 2  ;;  %v249_v47 = vmul.f32 0.30780134, %v241_v38  ;;  %s587_s25 = sshll.u32 %s1038_s24, 4 }
  0x59   : > { %363 = vrot.lane.b32.xlu0 %v346_v40, %s774_s20  ;;  %v329_v48 = vadd.f32 %v311_v36, %v292_v42  ;;  %v257_v49 = vmul.f32 0.38439733, %v241_v38  ;;  %v253_v50 = vmul.f32 0.30780134, %v245_v39  ;;  %v261_v51 = vmul.f32 0.38439733, %v245_v39  ;;  %s985_s8 = scalar_lea.vmem %s1023_s2, %s587_s25 }
  0x5a   : > { %v333_v52 = vadd.f32 %v317_v43, %v296_v44  ;;  %v299_v53 = vadd.f32 %v282_v45, %v254_v26  ;;  %v312_v54 = vrot.slane %v249_v47, 2  ;;  %v338_v58 = vmul.f32 0.30780134, %v330_v31 }
  0x5b   : > { %v345_v55 = vmul.f32 0.38439733, %v329_v48  ;;  %v275_v56 = vrot.slane %v257_v49, 1  ;;  %v281_v57 = vrot.slane %v261_v51, 1  ;;  %v318_v60 = vrot.slane %v253_v50, 2 }
  0x5c   : > { %371 = vrot.lane.b32.xlu1 %v350_v41, %s774_s20  ;;  %v336_v59 = vadd.f32 %v319_v46, %v299_v53  ;;  %v349_v61 = vmul.f32 0.38439733, %v333_v52  ;;  %v314_v63 = vsel %vm308_vm1, %v312_v54, %v313_v10  ;;  %v337_v6 = vmul.f32 0.30780134, %v329_v48 }
  0x5d   : > { %361 = vrot.lane.b32.xlu0 %v345_v55, %s774_s20  ;;  %v277_v62 = vsel %vm271_vm0, %v275_v56, %v276_v9  ;;  %v283_v0 = vsel %vm271_vm0, %v281_v57, %v282_v45  ;;  %v320_v3 = vsel %vm308_vm1, %v318_v60, %v319_v46  ;;  %v340_v10 = vmul.f32 0.30780134, %v332_v27 }
  0x5e   : > { %v294_v1 = vadd.f32 %v277_v62, %v249_v47  ;;  %v298_v2 = vadd.f32 %v283_v0, %v253_v50  ;;  %v352_v4 = vmul.f32 0.38439733, %v336_v59  ;;  %v342_v12 = vmul.f32 0.30780134, %v334_v32 }
  0x5f   : > { %v341_v13 = vmul.f32 0.30780134, %v333_v52  ;;  %v344_v14 = vmul.f32 0.30780134, %v336_v59  ;;  %vm435_vm2 = vcmask 111616   ;;  %vm433_vm3 = vcmask 113664  }
  0x60   : > { %403 = vrot.lane.b32.xlu1 %v338_v58, %s775_s30  ;;  %v331_v5 = vadd.f32 %v314_v63, %v294_v1  ;;  %v335_v7 = vadd.f32 %v320_v3, %v298_v2 }
  0x61   : > { %369 = vrot.lane.b32.xlu0 %v349_v61, %s774_s20 }
  0x62   : > { %v347_v8 = vmul.f32 0.38439733, %v331_v5  ;;  %v351_v9 = vmul.f32 0.38439733, %v335_v7  ;;  %v339_v11 = vmul.f32 0.30780134, %v331_v5 }
  0x63   : > { %v343_v15 = vmul.f32 0.30780134, %v335_v7 }
  0x64   : > { %375 = vrot.lane.b32.xlu1 %v352_v4, %s774_s20 }
  0x65   : > { %401 = vrot.lane.b32.xlu0 %v337_v6, %s775_s30 }
  0x68   : > { %365 = vrot.lane.b32.xlu1 %v347_v8, %s774_s20 }
  0x69   : > { %373 = vrot.lane.b32.xlu0 %v351_v9, %s774_s20 }
  0x6c   : > { %407 = vrot.lane.b32.xlu1 %v340_v10, %s775_s30 }
  0x6d   : > { %405 = vrot.lane.b32.xlu0 %v339_v11, %s775_s30 }
  0x70   : > { %411 = vrot.lane.b32.xlu1 %v342_v12, %s775_s30 }
  0x71   : > { %409 = vrot.lane.b32.xlu0 %v341_v13, %s775_s30 }
  0x74   : > { %415 = vrot.lane.b32.xlu1 %v344_v14, %s775_s30 }
  0x75   : > { %413 = vrot.lane.b32.xlu0 %v343_v15, %s775_s30 }
  0xca   : > { %v368_v16 = vpop.permute.xlu1 %367 }
  0xcb   : > { %v364_v17 = vpop.permute.xlu0 %363  ;;  %v388_v30 = vadd.f32 %v368_v16, %v340_v10 }
  0xcc   : > { %v386_v20 = vadd.f32 %v364_v17, %v338_v58 }
  0xce   : > { %v372_v18 = vpop.permute.xlu1 %371 }
  0xcf   : > { %v362_v19 = vpop.permute.xlu0 %361  ;;  %v390_v36 = vadd.f32 %v372_v18, %v342_v12 }
  0xd0   : > { %v385_v24 = vadd.f32 %v362_v19, %v337_v6 }
  0xd2   : > { %v404_v21 = vpop.permute.xlu1 %403 }
  0xd3   : > { %v426_v22 = vadd.f32 %v404_v21, %v386_v20  ;;  %v370_v23 = vpop.permute.xlu0 %369 }
  0xd4   : > { %v389_v37 = vadd.f32 %v370_v23, %v341_v13 }
  0xd5   : > { %436 = vst.msk [vmem:[%s985_s8 + $0x8] sm:$0x3f] %vm435_vm2, %v426_v22 }
  0xd6   : > { %v376_v25 = vpop.permute.xlu1 %375 }
  0xd7   : > { %v402_v26 = vpop.permute.xlu0 %401  ;;  %v392_v42 = vadd.f32 %v376_v25, %v344_v14 }
  0xd8   : > { %v425_v27 = vadd.f32 %v402_v26, %v385_v24 }
  0xda   : > { %434 = vst.msk [vmem:[%s985_s8] sm:$0xff] %vm433_vm3, %v425_v27  ;;  %v366_v28 = vpop.permute.xlu1 %365 }
  0xdb   : > { %v374_v29 = vpop.permute.xlu0 %373  ;;  %v387_v31 = vadd.f32 %v366_v28, %v339_v11 }
  0xdc   : > { %v391_v43 = vadd.f32 %v374_v29, %v343_v15 }
  0xde   : > { %v408_v32 = vpop.permute.xlu1 %407 }
  0xdf   : > { %v428_v33 = vadd.f32 %v408_v32, %v388_v30  ;;  %v406_v34 = vpop.permute.xlu0 %405 }
  0xe0   : > { %v427_v35 = vadd.f32 %v406_v34, %v387_v31 }
  0xe1   : > { %438 = vst.msk [vmem:[%s985_s8 + $0x18] sm:$0x3f] %vm435_vm2, %v428_v33 }
  0xe2   : > { %437 = vst.msk [vmem:[%s985_s8 + $0x10] sm:$0xff] %vm433_vm3, %v427_v35  ;;  %v412_v38 = vpop.permute.xlu1 %411 }
  0xe3   : > { %v430_v39 = vadd.f32 %v412_v38, %v390_v36  ;;  %v410_v40 = vpop.permute.xlu0 %409 }
  0xe4   : > { %v429_v41 = vadd.f32 %v410_v40, %v389_v37 }
  0xe5   : > { %440 = vst.msk [vmem:[%s985_s8 + $0x28] sm:$0x3f] %vm435_vm2, %v430_v39 }
  0xe6   : > { %439 = vst.msk [vmem:[%s985_s8 + $0x20] sm:$0xff] %vm433_vm3, %v429_v41  ;;  %v416_v44 = vpop.permute.xlu1 %415 }
  0xe7   : > { %v432_v45 = vadd.f32 %v416_v44, %v392_v42  ;;  %v414_v46 = vpop.permute.xlu0 %413 }
  0xe8   : > { %v431_v47 = vadd.f32 %v414_v46, %v391_v43 }
  0xe9   : > { %442 = vst.msk [vmem:[%s985_s8 + $0x38] sm:$0x3f] %vm435_vm2, %v432_v45 }
  0xea   : > { %441 = vst.msk [vmem:[%s985_s8 + $0x30] sm:$0xff] %vm433_vm3, %v431_v47 }
  0xeb PF: > { %s18_s14 = sadd.s32 1, %s767_s14   ;;  %s1030_s9 = smov %s751_s10 }
  0xec   : > { %p15_p11 = scmp.ge.s32.totalorder %s18_s14, 4   ;;  %s1031_s10 = smov %s755_s11 }
  0xed   : > { %s1032_s11 = smov %s840_s21  ;;  %s1033_s12 = smov %s763_s13 }
  0xee   : > { %s1034_s13 = smov %s1036_s16  ;;  %17 = sbr.rel (!%p15_p11) target bundleno = 6 (0x6), region = 81 }
  0xf5   :  { %476 = vsyncpa [#allocation3], 1 }
  0xf6   :  { %478 = vsyncpa [#allocation3 + $0x1], 1 }
  0xf7   :  { %479 = vsyncpa [#allocation5], 1 }
  0xf8   :  { %481 = vsyncpa [#allocation5 + $0x1], 1 }

</bundles_post_ra>
